<compile_context>
chip_gen: v6e
topology: v6e:2x2x1
jax: 0.10.0
libtpu: 0.0.40
codegen_flags: <defaults>
</compile_context>

<pallas_src>
import math
import functools

import jax
import jax.numpy as jnp
import numpy as np
from jax.experimental import pallas as pl
from jax.experimental.pallas import tpu as pltpu

EPS = 1e-5
VMEM_LIMIT = 32 * 1024 * 1024   # safe on v5e/v6e and within v7x's 64 MiB VMEM


def _pick_divisor_tile(total, max_tile=2048, align=128):
    """Largest multiple of `align` <= max_tile that divides `total`, else total."""
    cand = (min(max_tile, total) // align) * align
    while cand >= align:
        if total % cand == 0:
            return cand
        cand -= align
    return total


def _pick_out_tile(t_out):
    """Output-time tile: full if small, else a lane-aligned 256-wide tile."""
    if t_out <= 512:
        return t_out, 1
    t_ot = 256
    return t_ot, -(-t_out // t_ot)


# ----------------------------------------------------------------------------
# Pass 1: per-batch sum & sum-of-squares (single read of x, single-pass var).
# ----------------------------------------------------------------------------
def _stats_kernel(x_ref, sum_ref, ssq_ref):
    j = pl.program_id(1)

    @pl.when(j == 0)
    def _():
        sum_ref[...] = jnp.zeros_like(sum_ref)
        ssq_ref[...] = jnp.zeros_like(ssq_ref)

    x = x_ref[...].astype(jnp.float32)
    sum_ref[...] += jnp.sum(x)
    ssq_ref[...] += jnp.sum(x * x)


def _moments(x):
    B, C, T = x.shape
    t_stat = _pick_divisor_tile(T)
    n_stat = T // t_stat
    s, ss = pl.pallas_call(
        _stats_kernel,
        out_shape=(jax.ShapeDtypeStruct((B, 1, 1), jnp.float32),
                   jax.ShapeDtypeStruct((B, 1, 1), jnp.float32)),
        grid_spec=pltpu.PrefetchScalarGridSpec(
            num_scalar_prefetch=0,
            grid=(B, n_stat),
            in_specs=[pl.BlockSpec((1, C, t_stat), lambda b, j: (b, 0, j))],
            out_specs=(pl.BlockSpec((1, 1, 1), lambda b, j: (b, 0, 0)),
                       pl.BlockSpec((1, 1, 1), lambda b, j: (b, 0, 0)))),
        compiler_params=pltpu.CompilerParams(
            dimension_semantics=("parallel", "arbitrary"),
            vmem_limit_bytes=VMEM_LIMIT),
    )(x)
    n = float(C * T)
    mean = s[:, 0, 0] / n
    var = ss[:, 0, 0] / n - mean * mean
    rstd = jax.lax.rsqrt(var + EPS)
    return mean, rstd


# ----------------------------------------------------------------------------
# Pass 2: fused norm-apply + strided Conv1d (one bf16 MXU dot per output tile).
# ----------------------------------------------------------------------------
def _dsconv_kernel(body_ref, halo_ref, scale_ref, shift_ref, w_ref, bias_ref,
                   o_ref, *, K, stride, t_out_tile, pad_l, t_len):
    j = pl.program_id(1)
    body = body_ref[0].astype(jnp.float32)   # (stride, C, T_OT)
    halo = halo_ref[0].astype(jnp.float32)   # (stride, C, QhP)
    xw = jnp.concatenate([body, halo], axis=-1)            # (stride, C, W)
    w_cols = xw.shape[-1]

    # Padded-time coordinate of every deinterleaved column: u = m*stride + r.
    m_idx = jax.lax.broadcasted_iota(jnp.int32, (stride, 1, w_cols), 2) \
        + j * t_out_tile
    r_idx = jax.lax.broadcasted_iota(jnp.int32, (stride, 1, w_cols), 0)
    u = m_idx * stride + r_idx
    valid = jnp.logical_and(u >= pad_l, u < pad_l + t_len)

    scale = scale_ref[0][None]   # (1, C, 1)  = rstd[b] * gamma[c]
    shift = shift_ref[0][None]   # (1, C, 1)  = beta[c] - mean[b]*rstd[b]*gamma[c]
    # Normalized input; zero-padding stays exactly zero (only the shift is masked).
    xn = (xw * scale + jnp.where(valid, shift, 0.0)).astype(jnp.bfloat16)

    # im2col built only in VMEM: contiguous static slices, no strided access.
    pieces = []
    for k in range(K):           # static unroll, K small
        r = k % stride
        q = k // stride
        pieces.append(xn[r, :, q:q + t_out_tile])
    xcol = jnp.concatenate(pieces, axis=0)                   # (K*C, T_OT)

    y = jnp.dot(w_ref[...], xcol, preferred_element_type=jnp.float32)
    o_ref[0] = (y + bias_ref[...]).astype(o_ref.dtype)


def downsample_forward(x, gamma, beta, weight, bias, *, stride, pad):
    B, C, T = x.shape
    C_out, C_in, K = weight.shape
    assert C_in == C
    pad_l, pad_r = pad
    u_eff = pad_l + T + pad_r
    assert u_eff >= K, "input too short for kernel"
    t_out = (u_eff - K) // stride + 1

    t_ot, n_t = _pick_out_tile(t_out)
    qh = (K - 1) // stride          # halo width in deinterleaved columns
    qhp = max(qh, 1)
    m_body = n_t * t_ot
    u_alloc = (m_body + qhp) * stride

    # ---- pass 1: per-batch moments (reads raw x once) ----
    mean, rstd = _moments(x)
    scale = (rstd[:, None] * gamma[None, :]).reshape(B, C, 1).astype(jnp.float32)
    shift = (beta[None, :] - mean[:, None] * rstd[:, None] * gamma[None, :]) \
        .reshape(B, C, 1).astype(jnp.float32)

    # ---- host prep: single pad + stride de-interleave (one XLA pass over x) ----
    xp = jnp.pad(x, ((0, 0), (0, 0),
                     (pad_l, max(u_alloc - pad_l - T, 0))))[:, :, :u_alloc]
    xd_body = jnp.transpose(
        xp[:, :, :m_body * stride].reshape(B, C, m_body, stride), (0, 3, 1, 2))
    # Tiny per-tile halo: ceil((K-1)/stride) deinterleaved columns per tile.
    halo_u = ((jnp.arange(n_t) + 1) * (t_ot * stride))[:, None] \
        + jnp.arange(qhp * stride)[None, :]
    xh = jnp.take(xp, halo_u.reshape(-1), axis=2).reshape(B, C, n_t, qhp, stride)
    xd_halo = jnp.transpose(xh, (0, 2, 4, 1, 3)).reshape(B * n_t, stride, C, qhp)

    w_flat = jnp.transpose(weight, (0, 2, 1)).reshape(C_out, K * C) \
        .astype(jnp.bfloat16)                  # bf16 MXU operand, f32 accumulate
    bias2 = bias.reshape(C_out, 1).astype(jnp.float32)

    kern = functools.partial(_dsconv_kernel, K=K, stride=stride,
                             t_out_tile=t_ot, pad_l=pad_l, t_len=T)
    y = pl.pallas_call(
        kern,
        out_shape=jax.ShapeDtypeStruct((B, C_out, n_t * t_ot), x.dtype),
        grid_spec=pltpu.PrefetchScalarGridSpec(
            num_scalar_prefetch=0,
            grid=(B, n_t),
            in_specs=[
                pl.BlockSpec((1, stride, C, t_ot), lambda b, j: (b, 0, 0, j)),
                pl.BlockSpec((1, stride, C, qhp),
                             lambda b, j: (b * n_t + j, 0, 0, 0)),
                pl.BlockSpec((1, C, 1), lambda b, j: (b, 0, 0)),
                pl.BlockSpec((1, C, 1), lambda b, j: (b, 0, 0)),
                pl.BlockSpec((C_out, K * C), lambda b, j: (0, 0)),
                pl.BlockSpec((C_out, 1), lambda b, j: (0, 0)),
            ],
            out_specs=pl.BlockSpec((1, C_out, t_ot), lambda b, j: (b, 0, j))),
        compiler_params=pltpu.CompilerParams(
            dimension_semantics=("parallel", "parallel"),
            vmem_limit_bytes=VMEM_LIMIT),
    )(xd_body, xd_halo, scale, shift, w_flat, bias2)

    if n_t * t_ot != t_out:
        y = y[:, :, :t_out]
    return y


# ----------------------------------------------------------------------------
# Downsample module (JAX wrapper)
# ----------------------------------------------------------------------------
class Downsample:
    def __init__(self, n_channels, kernel_size, stride, *, causal_padding=False,
                 future_padding=False, out_channels=None, key=None):
        self.stride = stride
        if out_channels is None:
            out_channels = n_channels
        total = max(kernel_size - stride, 0)
        if causal_padding:
            pad = (total, 0)
        elif future_padding:
            pad = (0, total)
        else:
            pad = (total // 2, total - total // 2)
        self.pad = pad
        self.kernel_size = kernel_size

        key = jax.random.PRNGKey(0) if key is None else key
        kw, kb, kg, kbeta = jax.random.split(key, 4)
        fan_in = n_channels * kernel_size
        bound = 1.0 / math.sqrt(fan_in)
        self.weight = jax.random.uniform(kw, (out_channels, n_channels, kernel_size),
                                         jnp.float32, -bound, bound)
        self.bias = jax.random.uniform(kb, (out_channels,), jnp.float32, -bound, bound)
        # norm affine params (deterministic, non-trivial)
        self.gamma = 1.0 + 0.1 * jax.random.normal(kg, (n_channels,), jnp.float32)
        self.beta = 0.1 * jax.random.normal(kbeta, (n_channels,), jnp.float32)

        self._fwd = jax.jit(functools.partial(
            downsample_forward, stride=self.stride, pad=self.pad))

    def __call__(self, value, length):
        """value: (B, C, T); length: (B,) int32. Returns (value_out, length_out)."""
        new_length = jnp.ceil(length.astype(jnp.float32)
                              / float(self.stride)).astype(jnp.int32)
        y = self._fwd(value, self.gamma, self.beta, self.weight, self.bias)
        return y, new_length


# ----------------------------------------------------------------------------
# Pure-JAX reference (for correctness check)
# ----------------------------------------------------------------------------
def ref_forward(value, gamma, beta, weight, bias, stride, pad):
    mean = value.mean(axis=(1, 2), keepdims=True)
    var = ((value - mean) ** 2).mean(axis=(1, 2), keepdims=True)
    xn = (value - mean) / jnp.sqrt(var + EPS)
    xn = xn * gamma[None, :, None] + beta[None, :, None]
    xp = jnp.pad(xn, ((0, 0), (0, 0), (pad[0], pad[1])))
    y = jax.lax.conv_general_dilated(
        xp, weight, window_strides=(stride,), padding="VALID",
        dimension_numbers=("NCH", "OIH", "NCH"))
    return y + bias[None, :, None]


if __name__ == "__main__":
    key = jax.random.PRNGKey(0)
    kx, kp, kx2, kp2 = jax.random.split(key, 4)

    # --- config 1: tiny shapes (single-tile path) ---
    B, C, T, K, stride = 2, 4, 16, 4, 2
    x = jax.random.normal(kx, (B, C, T), jnp.float32)
    length = jnp.array([T, T - 3], dtype=jnp.int32)
    mod = Downsample(n_channels=C, kernel_size=K, stride=stride, key=kp)

    y, new_len = mod(x, length)
    y = jax.block_until_ready(y)
    new_len = jax.block_until_ready(new_len)

    y_ref = ref_forward(x, mod.gamma, mod.beta, mod.weight, mod.bias, stride, mod.pad)
    np.testing.assert_allclose(np.asarray(y), np.asarray(y_ref), rtol=3e-2, atol=3e-2)
    t_out = (T + mod.pad[0] + mod.pad[1] - K) // stride + 1
    assert y.shape == (B, C, t_out)
    assert list(np.asarray(new_len)) == [math.ceil(T / stride), math.ceil((T - 3) / stride)]

    # --- config 2: exercises the lane-aligned time-tiled path ---
    B2, C2, T2, K2, s2 = 2, 8, 1280, 4, 2
    x2 = jax.random.normal(kx2, (B2, C2, T2), jnp.float32)
    len2 = jnp.array([T2, T2 // 2], dtype=jnp.int32)
    mod2 = Downsample(n_channels=C2, kernel_size=K2, stride=s2, key=kp2)

    y2, nl2 = mod2(x2, len2)
    y2 = jax.block_until_ready(y2)
    y2_ref = ref_forward(x2, mod2.gamma, mod2.beta, mod2.weight, mod2.bias, s2, mod2.pad)
    np.testing.assert_allclose(np.asarray(y2), np.asarray(y2_ref), rtol=3e-2, atol=3e-2)

    print("KERNEL_OK")
</pallas_src>

<mosaic_0001>
module attributes {stable_mosaic.version = 11 : i64} {
  func.func @_stats_kernel(%arg0: i32, %arg1: i32, %arg2: memref<1x4x16xf32, #tpu.memory_space<vmem>>, %arg3: memref<1x1x1xf32, #tpu.memory_space<vmem>>, %arg4: memref<1x1x1xf32, #tpu.memory_space<vmem>>) attributes {dimension_semantics = [#tpu.dimension_semantics<parallel>, #tpu.dimension_semantics<arbitrary>], iteration_bounds = array<i64: 2, 1>, scalar_prefetch = 0 : i64, scratch_operands = 0 : i64, tpu.core_type = #tpu.core_type<tc>, window_params = [{transform_indices = @transform_0, window_bounds = array<i64: 1, 4, 16>}, {transform_indices = @transform_1, window_bounds = array<i64: 1, 1, 1>}, {transform_indices = @transform_2, window_bounds = array<i64: 1, 1, 1>}]} {
    %c0_i32 = arith.constant 0 : i32
    %0 = arith.cmpi eq, %arg1, %c0_i32 : i32
    %1 = arith.extui %0 : i1 to i32
    %c0_i32_0 = arith.constant 0 : i32
    %2 = arith.cmpi ne, %1, %c0_i32_0 : i32
    scf.if %2 {
      %cst_16 = arith.constant 0.000000e+00 : f32
      %21 = vector.broadcast %cst_16 : f32 to vector<1x1x1xf32>
      %c0_17 = arith.constant 0 : index
      %c0_18 = arith.constant 0 : index
      %c0_19 = arith.constant 0 : index
      %22 = vector.load %arg3[%c0_17, %c0_18, %c0_19] : memref<1x1x1xf32, #tpu.memory_space<vmem>>, vector<1x1x1xf32>
      tpu.vector_store %arg3[%c0_17, %c0_18, %c0_19], %21 {strides = array<i32>} : memref<1x1x1xf32, #tpu.memory_space<vmem>>, vector<1x1x1xf32>,
      %cst_20 = arith.constant 0.000000e+00 : f32
      %23 = vector.broadcast %cst_20 : f32 to vector<1x1x1xf32>
      %c0_21 = arith.constant 0 : index
      %c0_22 = arith.constant 0 : index
      %c0_23 = arith.constant 0 : index
      %24 = vector.load %arg4[%c0_21, %c0_22, %c0_23] : memref<1x1x1xf32, #tpu.memory_space<vmem>>, vector<1x1x1xf32>
      tpu.vector_store %arg4[%c0_21, %c0_22, %c0_23], %23 {strides = array<i32>} : memref<1x1x1xf32, #tpu.memory_space<vmem>>, vector<1x1x1xf32>,
    } else {
    }
    %c0 = arith.constant 0 : index
    %c0_1 = arith.constant 0 : index
    %c0_2 = arith.constant 0 : index
    %3 = vector.load %arg2[%c0, %c0_1, %c0_2] : memref<1x4x16xf32, #tpu.memory_space<vmem>>, vector<1x4x16xf32>
    %c0_3 = arith.constant 0 : index
    %c0_4 = arith.constant 0 : index
    %c0_5 = arith.constant 0 : index
    %4 = vector.load %arg3[%c0_3, %c0_4, %c0_5] : memref<1x1x1xf32, #tpu.memory_space<vmem>>, vector<1x1x1xf32>
    %5 = vector.shape_cast %3 : vector<1x4x16xf32> to vector<1x1x4x16xf32>
    %cst = arith.constant dense<0.000000e+00> : vector<1xf32>
    %6 = vector.multi_reduction <add>, %5, %cst [1, 2, 3] : vector<1x1x4x16xf32> to vector<1xf32>
    %7 = vector.shape_cast %6 : vector<1xf32> to vector<1x1x1x1xf32>
    %8 = vector.extract %7[0, 0, 0, 0] : f32 from vector<1x1x1x1xf32>
    %9 = vector.broadcast %8 : f32 to vector<1x1x1xf32>
    %10 = arith.addf %4, %9 : vector<1x1x1xf32>
    %c0_6 = arith.constant 0 : index
    %c0_7 = arith.constant 0 : index
    %c0_8 = arith.constant 0 : index
    %11 = vector.load %arg3[%c0_6, %c0_7, %c0_8] : memref<1x1x1xf32, #tpu.memory_space<vmem>>, vector<1x1x1xf32>
    tpu.vector_store %arg3[%c0_6, %c0_7, %c0_8], %10 {strides = array<i32>} : memref<1x1x1xf32, #tpu.memory_space<vmem>>, vector<1x1x1xf32>,
    %c0_9 = arith.constant 0 : index
    %c0_10 = arith.constant 0 : index
    %c0_11 = arith.constant 0 : index
    %12 = vector.load %arg4[%c0_9, %c0_10, %c0_11] : memref<1x1x1xf32, #tpu.memory_space<vmem>>, vector<1x1x1xf32>
    %13 = arith.mulf %3, %3 : vector<1x4x16xf32>
    %14 = vector.shape_cast %13 : vector<1x4x16xf32> to vector<1x1x4x16xf32>
    %cst_12 = arith.constant dense<0.000000e+00> : vector<1xf32>
    %15 = vector.multi_reduction <add>, %14, %cst_12 [1, 2, 3] : vector<1x1x4x16xf32> to vector<1xf32>
    %16 = vector.shape_cast %15 : vector<1xf32> to vector<1x1x1x1xf32>
    %17 = vector.extract %16[0, 0, 0, 0] : f32 from vector<1x1x1x1xf32>
    %18 = vector.broadcast %17 : f32 to vector<1x1x1xf32>
    %19 = arith.addf %12, %18 : vector<1x1x1xf32>
    %c0_13 = arith.constant 0 : index
    %c0_14 = arith.constant 0 : index
    %c0_15 = arith.constant 0 : index
    %20 = vector.load %arg4[%c0_13, %c0_14, %c0_15] : memref<1x1x1xf32, #tpu.memory_space<vmem>>, vector<1x1x1xf32>
    tpu.vector_store %arg4[%c0_13, %c0_14, %c0_15], %19 {strides = array<i32>} : memref<1x1x1xf32, #tpu.memory_space<vmem>>, vector<1x1x1xf32>,
    return
  }
  func.func @transform_0(%arg0: i32, %arg1: i32) -> (i32, i32, i32) {
    %c0_i32 = arith.constant 0 : i32
    %c0_i32_0 = arith.constant 0 : i32
    return %arg0, %c0_i32, %arg1 : i32, i32, i32
  }
  func.func @transform_1(%arg0: i32, %arg1: i32) -> (i32, i32, i32) {
    %c0_i32 = arith.constant 0 : i32
    %c0_i32_0 = arith.constant 0 : i32
    %c0_i32_1 = arith.constant 0 : i32
    return %arg0, %c0_i32, %c0_i32_0 : i32, i32, i32
  }
  func.func @transform_2(%arg0: i32, %arg1: i32) -> (i32, i32, i32) {
    %c0_i32 = arith.constant 0 : i32
    %c0_i32_0 = arith.constant 0 : i32
    %c0_i32_1 = arith.constant 0 : i32
    return %arg0, %c0_i32, %c0_i32_0 : i32, i32, i32
  }
}

module attributes {stable_mosaic.version = 11 : i64} {
  func.func @_dsconv_kernel(%arg0: i32, %arg1: i32, %arg2: memref<1x2x4x8xf32, #tpu.memory_space<vmem>>, %arg3: memref<1x2x4x1xf32, #tpu.memory_space<vmem>>, %arg4: memref<1x4x1xf32, #tpu.memory_space<vmem>>, %arg5: memref<1x4x1xf32, #tpu.memory_space<vmem>>, %arg6: memref<4x16xbf16, #tpu.memory_space<vmem>>, %arg7: memref<4x1xf32, #tpu.memory_space<vmem>>, %arg8: memref<1x4x8xf32, #tpu.memory_space<vmem>>) attributes {dimension_semantics = [#tpu.dimension_semantics<parallel>, #tpu.dimension_semantics<parallel>], iteration_bounds = array<i64: 2, 1>, scalar_prefetch = 0 : i64, scratch_operands = 0 : i64, tpu.core_type = #tpu.core_type<tc>, window_params = [{transform_indices = @transform_0, window_bounds = array<i64: 1, 2, 4, 8>}, {transform_indices = @transform_1, window_bounds = array<i64: 1, 2, 4, 1>}, {transform_indices = @transform_2, window_bounds = array<i64: 1, 4, 1>}, {transform_indices = @transform_3, window_bounds = array<i64: 1, 4, 1>}, {pipeline_mode = #tpu.pipeline_mode<synchronous>, transform_indices = @transform_4, window_bounds = array<i64: 4, 16>}, {pipeline_mode = #tpu.pipeline_mode<synchronous>, transform_indices = @transform_5, window_bounds = array<i64: 4, 1>}, {transform_indices = @transform_6, window_bounds = array<i64: 1, 4, 8>}]} {
    %c0 = arith.constant 0 : index
    %c0_0 = arith.constant 0 : index
    %c0_1 = arith.constant 0 : index
    %c0_2 = arith.constant 0 : index
    %0 = vector.load %arg2[%c0, %c0_0, %c0_1, %c0_2] : memref<1x2x4x8xf32, #tpu.memory_space<vmem>>, vector<1x2x4x8xf32>
    %1 = vector.shape_cast %0 : vector<1x2x4x8xf32> to vector<2x4x8xf32>
    %c0_3 = arith.constant 0 : index
    %c0_4 = arith.constant 0 : index
    %c0_5 = arith.constant 0 : index
    %c0_6 = arith.constant 0 : index
    %2 = vector.load %arg3[%c0_3, %c0_4, %c0_5, %c0_6] : memref<1x2x4x1xf32, #tpu.memory_space<vmem>>, vector<1x2x4x1xf32>
    %3 = vector.shape_cast %2 : vector<1x2x4x1xf32> to vector<2x4x1xf32>
    %4 = tpu.concatenate %1, %3 in 2 : vector<2x4x8xf32>, vector<2x4x1xf32> -> vector<2x4x9xf32>
    %5 = tpu.iota {dimensions = array<i32: 2>} : vector<2x1x9xi32>
    %c8_i32 = arith.constant 8 : i32
    %6 = arith.muli %arg1, %c8_i32 : i32
    %7 = vector.broadcast %6 : i32 to vector<2x1x9xi32>
    %8 = arith.addi %5, %7 : vector<2x1x9xi32>
    %9 = tpu.iota {dimensions = array<i32: 0>} : vector<2x1x9xi32>
    %c2_i32 = arith.constant 2 : i32
    %10 = vector.broadcast %c2_i32 : i32 to vector<2x1x9xi32>
    %11 = arith.muli %8, %10 : vector<2x1x9xi32>
    %12 = arith.addi %11, %9 : vector<2x1x9xi32>
    %c1_i32 = arith.constant 1 : i32
    %13 = vector.broadcast %c1_i32 : i32 to vector<2x1x9xi32>
    %14 = arith.cmpi sge, %12, %13 : vector<2x1x9xi32>
    %c17_i32 = arith.constant 17 : i32
    %15 = vector.broadcast %c17_i32 : i32 to vector<2x1x9xi32>
    %16 = arith.cmpi slt, %12, %15 : vector<2x1x9xi32>
    %17 = arith.andi %14, %16 : vector<2x1x9xi1>
    %c0_7 = arith.constant 0 : index
    %c0_8 = arith.constant 0 : index
    %c0_9 = arith.constant 0 : index
    %18 = vector.load %arg4[%c0_7, %c0_8, %c0_9] : memref<1x4x1xf32, #tpu.memory_space<vmem>>, vector<1x4x1xf32>
    %19 = vector.shape_cast %18 : vector<1x4x1xf32> to vector<4x1xf32>
    %20 = vector.shape_cast %19 : vector<4x1xf32> to vector<1x4x1xf32>
    %c0_10 = arith.constant 0 : index
    %c0_11 = arith.constant 0 : index
    %c0_12 = arith.constant 0 : index
    %21 = vector.load %arg5[%c0_10, %c0_11, %c0_12] : memref<1x4x1xf32, #tpu.memory_space<vmem>>, vector<1x4x1xf32>
    %22 = vector.shape_cast %21 : vector<1x4x1xf32> to vector<4x1xf32>
    %23 = vector.shape_cast %22 : vector<4x1xf32> to vector<1x4x1xf32>
    %24 = vector.broadcast %20 : vector<1x4x1xf32> to vector<2x4x9xf32>
    %25 = arith.mulf %4, %24 : vector<2x4x9xf32>
    %cst = arith.constant 0.000000e+00 : f32
    %26 = vector.shape_cast %17 : vector<2x1x9xi1> to vector<2x1x9xi1>
    %27 = vector.broadcast %26 : vector<2x1x9xi1> to vector<2x4x9xi1>
    %28 = vector.shape_cast %23 : vector<1x4x1xf32> to vector<1x4x1xf32>
    %29 = vector.broadcast %28 : vector<1x4x1xf32> to vector<2x4x9xf32>
    %30 = vector.broadcast %cst : f32 to vector<2x4x9xf32>
    %31 = arith.select %27, %29, %30 : vector<2x4x9xi1>, vector<2x4x9xf32>
    %32 = arith.addf %25, %31 : vector<2x4x9xf32>
    %33 = arith.truncf %32 : vector<2x4x9xf32> to vector<2x4x9xbf16>
    %34 = vector.extract_strided_slice %33 {offsets = [0, 0, 0], sizes = [1, 4, 8], strides = [1, 1, 1]} : vector<2x4x9xbf16> to vector<1x4x8xbf16>
    %35 = vector.shape_cast %34 : vector<1x4x8xbf16> to vector<4x8xbf16>
    %36 = vector.extract_strided_slice %33 {offsets = [1, 0, 0], sizes = [1, 4, 8], strides = [1, 1, 1]} : vector<2x4x9xbf16> to vector<1x4x8xbf16>
    %37 = vector.shape_cast %36 : vector<1x4x8xbf16> to vector<4x8xbf16>
    %38 = vector.extract_strided_slice %33 {offsets = [0, 0, 1], sizes = [1, 4, 8], strides = [1, 1, 1]} : vector<2x4x9xbf16> to vector<1x4x8xbf16>
    %39 = vector.shape_cast %38 : vector<1x4x8xbf16> to vector<4x8xbf16>
    %40 = vector.extract_strided_slice %33 {offsets = [1, 0, 1], sizes = [1, 4, 8], strides = [1, 1, 1]} : vector<2x4x9xbf16> to vector<1x4x8xbf16>
    %41 = vector.shape_cast %40 : vector<1x4x8xbf16> to vector<4x8xbf16>
    %42 = tpu.concatenate %35, %37, %39, %41 in 0 : vector<4x8xbf16>, vector<4x8xbf16>, vector<4x8xbf16>, vector<4x8xbf16> -> vector<16x8xbf16>
    %c0_13 = arith.constant 0 : index
    %c0_14 = arith.constant 0 : index
    %43 = vector.load %arg6[%c0_13, %c0_14] : memref<4x16xbf16, #tpu.memory_space<vmem>>, vector<4x16xbf16>
    %cst_15 = arith.constant dense<0.000000e+00> : vector<4x8xf32>
    %44 = tpu.matmul %43, %42, %cst_15 {dimension_numbers = #tpu.dot_dimension_numbers<[1], [0], [0], [1], [0, 0, 1, 1], [], []>} : vector<4x16xbf16>, vector<16x8xbf16>, vector<4x8xf32> -> vector<4x8xf32>
    %c0_16 = arith.constant 0 : index
    %c0_17 = arith.constant 0 : index
    %45 = vector.load %arg7[%c0_16, %c0_17] : memref<4x1xf32, #tpu.memory_space<vmem>>, vector<4x1xf32>
    %46 = vector.broadcast %45 : vector<4x1xf32> to vector<4x8xf32>
    %47 = arith.addf %44, %46 : vector<4x8xf32>
    %c0_18 = arith.constant 0 : index
    %c0_19 = arith.constant 0 : index
    %c0_20 = arith.constant 0 : index
    %48 = vector.load %arg8[%c0_18, %c0_19, %c0_20] : memref<1x4x8xf32, #tpu.memory_space<vmem>>, vector<1x4x8xf32>
    %49 = vector.shape_cast %48 : vector<1x4x8xf32> to vector<4x8xf32>
    %50 = vector.shape_cast %47 : vector<4x8xf32> to vector<1x4x8xf32>
    tpu.vector_store %arg8[%c0_18, %c0_19, %c0_20], %50 {strides = array<i32>} : memref<1x4x8xf32, #tpu.memory_space<vmem>>, vector<1x4x8xf32>,
    return
  }
  func.func @transform_0(%arg0: i32, %arg1: i32) -> (i32, i32, i32, i32) {
    %c0_i32 = arith.constant 0 : i32
    %c0_i32_0 = arith.constant 0 : i32
    %c0_i32_1 = arith.constant 0 : i32
    return %arg0, %c0_i32, %c0_i32_0, %arg1 : i32, i32, i32, i32
  }
  func.func @transform_1(%arg0: i32, %arg1: i32) -> (i32, i32, i32, i32) {
    %c1_i32 = arith.constant 1 : i32
    %0 = arith.muli %arg0, %c1_i32 : i32
    %1 = arith.addi %0, %arg1 : i32
    %c0_i32 = arith.constant 0 : i32
    %c0_i32_0 = arith.constant 0 : i32
    %c0_i32_1 = arith.constant 0 : i32
    %c0_i32_2 = arith.constant 0 : i32
    return %1, %c0_i32, %c0_i32_0, %c0_i32_1 : i32, i32, i32, i32
  }
  func.func @transform_2(%arg0: i32, %arg1: i32) -> (i32, i32, i32) {
    %c0_i32 = arith.constant 0 : i32
    %c0_i32_0 = arith.constant 0 : i32
    %c0_i32_1 = arith.constant 0 : i32
    return %arg0, %c0_i32, %c0_i32_0 : i32, i32, i32
  }
  func.func @transform_3(%arg0: i32, %arg1: i32) -> (i32, i32, i32) {
    %c0_i32 = arith.constant 0 : i32
    %c0_i32_0 = arith.constant 0 : i32
    %c0_i32_1 = arith.constant 0 : i32
    return %arg0, %c0_i32, %c0_i32_0 : i32, i32, i32
  }
  func.func @transform_4(%arg0: i32, %arg1: i32) -> (i32, i32) {
    %c0_i32 = arith.constant 0 : i32
    %c0_i32_0 = arith.constant 0 : i32
    %c0_i32_1 = arith.constant 0 : i32
    return %c0_i32, %c0_i32_0 : i32, i32
  }
  func.func @transform_5(%arg0: i32, %arg1: i32) -> (i32, i32) {
    %c0_i32 = arith.constant 0 : i32
    %c0_i32_0 = arith.constant 0 : i32
    %c0_i32_1 = arith.constant 0 : i32
    return %c0_i32, %c0_i32_0 : i32, i32
  }
  func.func @transform_6(%arg0: i32, %arg1: i32) -> (i32, i32, i32) {
    %c0_i32 = arith.constant 0 : i32
    %c0_i32_0 = arith.constant 0 : i32
    return %arg0, %c0_i32, %arg1 : i32, i32, i32
  }
}

</mosaic_0001>

<bundles_post_ra>
// kernel: downsample_forward.2
= control target key start
LH: loop header
LB: loop body
LE: loop exit
PB: predicated region body
PF: predicated region fallthrough
CT: control target
= control target key end

     0   :  { %s368_s9 = smov 0   ;;  %s370_s10 = smov 0   ;;  %s408_s0 = inlined_call_operand.vmem [shape: f32[2,4,16], index: 0, kind: input, shape index: {}]   ;;  %s409_s1 = inlined_call_operand.vmem [shape: f32[2,1,1], index: 1, kind: output, shape index: {0}]   ;;  %s410_s2 = inlined_call_operand.vmem [shape: f32[2,1,1], index: 2, kind: output, shape index: {1}]  }
   0x1   :  { %s372_s11 = smov 0  }
   0x2 LB: > { %s25_s12 = sadd.s32 1, %s346_s10  ;;  %p295_p0 = scmp.ge.s32.totalorder %s350_s11, 1  ;;  %s350_s11 = sphi %s372_s11, %s13_s11   ;;  %s346_s10 = sphi %s370_s10, %s412_s10   ;;  %s342_s9 = sphi %s368_s9, %s411_s9  }
   0x3   : > { %p27_p1 = scmp.ge.s32.totalorder %s25_s12, 2  ;;  %p131_p2 = scmp.lt.s32.totalorder %s350_s11, 3 }
   0x5   : > { %s414_s12 = smov (%p27_p1, %s25_s12), 0  ;;  %p132_p3 = pnand %p295_p0, %p131_p2 }
   0x6   : > { %p156_p4 = scmp.lt.s32.totalorder (!%p132_p3), %s342_s9, 1 }
   0x7   : > { %135 = sbr.rel (%p132_p3) target bundleno = 225 (0xe1), region = 24 }
   0xc   : > { %s416_s9 = smov (!%p156_p4, %s342_s9), 1  ;;  %vm178_vm0 = vcmask 125952   ;;  %vm173_vm1 = vcmask 0   ;;  %v352_v4 = vmov 0.0  }
   0xd   : > { %s296_s13 = sshll.u32 %s416_s9, 2  ;;  %s165_s19 = scalar_lea.vmem %s409_s1, %s416_s9 }
   0xe   : > { %s162_s16 = scalar_lea.vmem %s408_s0, %s296_s13  ;;  %174 = vst.msk [vmem:[%s165_s19] sm:$0x1] %vm173_vm1, %v352_v4  ;;  %s168_s22 = scalar_lea.vmem %s410_s2, %s416_s9 }
   0xf   : > { %v176_v0 = vld [vmem:[%s162_s16] sm:$0xf]  ;;  %175 = vst.msk [vmem:[%s168_s22] sm:$0x1] %vm173_vm1, %v352_v4 }
  0x10   : > { %v179_v1 = vsel %vm178_vm0, %v176_v0, 0.0  ;;  %v194_v2 = vmul.f32 %v176_v0, %v176_v0 }
  0x11   : > { %180 = vadd.xlane.f32.xlu0 %v179_v1 }
  0x12   : > { %v195_v3 = vsel %vm178_vm0, %v194_v2, 0.0 }
  0x15   : > { %196 = vadd.xlane.f32.xlu0 %v195_v3  ;;  %v177_v19 = vld [vmem:[%s165_s19] sm:$0x1] }
  0x16   : > { %v193_v22 = vld [vmem:[%s168_s22] sm:$0x1] }
  0x9a   : > { %v181_v5 = vpop.xlane.xlu0 %180 }
  0x9b   : > { %v182_v6 = vrot.slane %v181_v5, 4 }
  0x9d   : > { %v183_v7 = vadd.f32 %v182_v6, %v181_v5 }
  0x9e   : > { %v197_v8 = vpop.xlane.xlu0 %196 }
  0x9f   : > { %v184_v9 = vrot.slane %v183_v7, 2  ;;  %v198_v10 = vrot.slane %v197_v8, 4 }
  0xa1   : > { %v199_v11 = vadd.f32 %v198_v10, %v197_v8  ;;  %v185_v12 = vadd.f32 %v184_v9, %v183_v7 }
  0xa3   : > { %v200_v13 = vrot.slane %v199_v11, 2  ;;  %v186_v14 = vrot.slane %v185_v12, 1 }
  0xa5   : > { %v201_v15 = vadd.f32 %v200_v13, %v199_v11  ;;  %v187_v16 = vadd.f32 %v186_v14, %v185_v12 }
  0xa7   : > { %299 = vpush %v187_v16  ;;  %v202_v17 = vrot.slane %v201_v15, 1 }
  0xa9   : > { %v203_v18 = vadd.f32 %v202_v17, %v201_v15 }
  0xab   : > { %301 = vpush %v203_v18 }
  0xd8   : > { %s300_s23 = spop %299 }
  0xd9   : > { %v189_v20 = vstv %s300_s23 }
  0xda   : > { %v190_v21 = vadd.f32 %v189_v20, %v177_v19 }
  0xdc   : > { %192 = vst.msk [vmem:[%s165_s19] sm:$0x1] %vm173_vm1, %v190_v21  ;;  %s302_s24 = spop %301 }
  0xdd   : > { %v205_v23 = vstv %s302_s24 }
  0xde   : > { %v206_v24 = vadd.f32 %v205_v23, %v193_v22 }
  0xe0   : > { %207 = vst.msk [vmem:[%s168_s22] sm:$0x1] %vm173_vm1, %v206_v24 }
  0xe1 PF: > { %s13_s11 = sadd.s32 1, %s350_s11   ;;  %s411_s9 = smov %s346_s10 }
  0xe2   : > { %p10_p5 = scmp.ge.s32.totalorder %s13_s11, 4   ;;  %s412_s10 = smov %s414_s12 }
  0xe4   :  { %12 = sbr.rel (!%p10_p5) target bundleno = 2 (0x2), region = 70 }

// kernel: downsample_forward.3
= control target key start
LH: loop header
LB: loop body
LE: loop exit
PB: predicated region body
PF: predicated region fallthrough
CT: control target
= control target key end

     0   :  { %11 = vsyncpa [#allocation3], 0  ;;  %s920_s0 = inlined_call_operand.vmem [shape: f32[2,2,4,8], index: 0, kind: input, shape index: {}]   ;;  %s921_s1 = inlined_call_operand.vmem [shape: f32[2,2,4,1], index: 1, kind: input, shape index: {}]   ;;  %s922_s2 = inlined_call_operand.vmem [shape: f32[2,4,1], index: 2, kind: input, shape index: {}]   ;;  %s923_s3 = inlined_call_operand.vmem [shape: f32[2,4,1], index: 3, kind: input, shape index: {}]   ;;  %s924_s4 = inlined_call_operand.vmem [shape: bf16[4,16], index: 4, kind: input, shape index: {}]   ;;  %s925_s5 = inlined_call_operand.vmem [shape: f32[4,1], index: 5, kind: input, shape index: {}]   ;;  %s926_s6 = inlined_call_operand.hbm [shape: f32[2,4,8], index: 6, kind: output, shape index: {}]  }
   0x1   :  { %13 = vsyncpa [#allocation3 + $0x1], 0  ;;  %s794_s21 = smov 0   ;;  %s796_s22 = smov 0  }
   0x2   :  { %s798_s23 = smov 0   ;;  %s800_s24 = smov 0  }
   0x3   :  { %s802_s25 = smov 0   ;;  %s804_s26 = smov 0  }
   0x4 LB: > { %s587_s27 = sadd.s32 4294967295, %s751_s26   ;;  %s588_s28 = sadd.s32 4294967294, %s751_s26   ;;  %s751_s26 = sphi %s804_s26, %s19_s26   ;;  %s747_s25 = sphi %s802_s25, %s933_s25   ;;  %s743_s24 = sphi %s800_s24, %s932_s24   ;;  %s739_s23 = sphi %s798_s23, %s931_s23   ;;  %s735_s22 = sphi %s796_s22, %s930_s22   ;;  %s731_s21 = sphi %s794_s21, %s929_s21  }
   0x5   : > { %s31_s29 = sadd.s32 1, %s747_s25  ;;  %s190_s30 = sadd.s32 1, %s739_s23 }
   0x6   : > { %p33_p0 = scmp.ge.s32.totalorder %s31_s29, 2  ;;  %p200_p1 = scmp.ne.s32.totalorder %s739_s23, %s735_s22 }
   0x7   : > { %p201_p2 = scmp.eq.s32.totalorder %s587_s27, 1  ;;  %p206_p3 = scmp.ne.s32.totalorder %s735_s22, %s731_s21 }
   0x8   : > { %s935_s29 = smov (%p33_p0, %s31_s29), 0  ;;  %p207_p5 = scmp.eq.s32.totalorder %s588_s28, 1 }
   0x9   : > { %p834_p4 = por %p201_p2, %p200_p1  ;;  %s185_s8 = ssub.s32 %s747_s25, %s935_s29 }
   0xa   : > { %p591_p6 = scmp.ge.s32.totalorder %s751_s26, 1  ;;  %p188_p7 = scmp.eq.s32.totalorder %s185_s8, 0 }
   0xb   : > { %p841_p8 = por %p207_p5, %p206_p3  ;;  %p266_p9 = scmp.lt.s32.totalorder %s751_s26, 3 }
   0xc   : > { %s847_s10 = scalar_select %p188_p7, %s739_s23, %s190_s30  }
   0xd   : > { %p267_p10 = pnand %p591_p6, %p266_p9 }
   0xe   : > { %p313_p11 = scmp.lt.s32.totalorder (!%p267_p10), %s743_s24, 1  ;;  %s754_s30 = smov (!%p267_p10), 8  }
   0xf   : > { %270 = sbr.rel (%p267_p10) target bundleno = 489 (0x1e9), region = 44  ;;  %s310_s18 = sand.u32 (!%p267_p10), 1, %s735_s22  }
  0x10   : > { %s601_s20 = sshll.u32 (!%p267_p10), %s743_s24, 6 }
  0x14   : > { %v753_v0 = vmov 0   ;;  %s314_s11 = scalar_select %p313_p11, %s743_s24, 1  ;;  %v352_v5 = vlaneseq  ;;  %vm349_vm0 = vcmask 64512   ;;  %v755_v14 = vmov 0.0   ;;  %v410_v30 = vld [vmem:[%s925_s5] sm:$0xf] }
  0x15   : > { %674 = vset.pattern.permute.xlu0 %v753_v0  ;;  %608 = vmatprep.subr.bf16.mxu0 %v755_v14  ;;  %vm756_vm7 = vmmov 0   ;;  %vm398_vm8 = vcmask 1041408   ;;  %vm402_vm9 = vcmask 1043456   ;;  %vm405_vm10 = vcmask 1045504   ;;  %v409_v35 = vld [vmem:[%s924_s4] sm:$0x3] }
  0x16   : > { %s597_s12 = sshll.u32 %s314_s11, 2  ;;  %s604_s13 = sshll.u32 %s314_s11, 3  ;;  %v353_v6 = vand.u32 127, %v352_v5  ;;  %610 = vmatprep.mubr.msk.bf16.mxu0 %vm756_vm7, %v755_v14  ;;  %vm416_vm11 = vcmask 130048   ;;  %vm460_vm12 = vcmask 60416  }
  0x17   : > { %s331_s16 = scalar_lea.vmem %s922_s2, %s597_s12  ;;  %s335_s19 = scalar_lea.vmem %s923_s3, %s597_s12 }
  0x18   : > { %v365_v1 = vld [vmem:[%s331_s16] sm:$0xf]  ;;  %s326_s28 = scalar_lea.vmem %s921_s1, %s604_s13  ;;  %v357_v7 = vmul.u32 2, %v353_v6  ;;  %s320_s12 = scalar_lea.vmem %s920_s0, %s604_s13 }
  0x19   : > { %369 = vperm.xlu0 %674, %v365_v1   ;;  %v339_v2 = vld [vmem:[%s326_s28] sm:$0xf]  ;;  %v340_v4 = vld [vmem:[%s326_s28 + $0x4] sm:$0xf]  ;;  %s757_s13 = smov 127   ;;  %s874_s11 = scalar_lea.hbm %s926_s6, %s601_s20 }
  0x1a   : > { %v366_v3 = vld [vmem:[%s335_s19] sm:$0xf]  ;;  %343 = vrot.lane.b32.xlu1 %v339_v2, %s754_s30  ;;  %v358_v9 = vadd.s32 1, %v357_v7  ;;  %v338_v12 = vld [vmem:[%s320_s12 + $0x4] sm:$0xf]  ;;  %vm359_vm1 = vcmp.ge.s32.totalorder %v357_v7, 1 }
  0x1b   : > { %v337_v10 = vld [vmem:[%s320_s12] sm:$0xf]  ;;  %vm361_vm2 = vcmp.lt.s32.totalorder %v357_v7, 17  ;;  %s592_s19 = sshll.u32 %s310_s18, 2  ;;  %s463_s24 = scalar_lea.sflag [#allocation3], %s310_s18 }
  0x1c   : > { %vm360_vm3 = vcmp.ge.s32.totalorder %v358_v9, 1  ;;  %vm362_vm4 = vcmp.lt.s32.totalorder %v358_v9, 17  ;;  %vm363_vm5 = vmand %vm359_vm1, %vm361_vm2  ;;  %s312_s27 = scalar_lea.vmem [#allocation2], %s592_s19 }
  0x1d   : > { %380 = vperm.xlu0 %674, %v366_v3   ;;  %vm364_vm6 = vmand %vm360_vm3, %vm362_vm4  ;;  %s477_s28 = sshll.u32 %s312_s27, 4  ;;  %s876_s28 = int_to_ptr.vmem [resolvable:$true] %s477_s28 }
  0x1e   : > { %345 = vrot.lane.b32.xlu1 %v340_v4, %s754_s30  ;;  %s675_s12 = scalar_lea.vmem %s876_s28, 64 }
  0x1f   : > { %p676_p12 = scmp.ne.s32.totalorder %s876_s28, %s675_s12 }
  0x21   : > { %p677_p13 = pnand %p676_p12, %p834_p4 }
  0x23   : > { %p678_p0 = pneg %p677_p13 }
  0x8c   : > { %v344_v8 = vpop.permute.xlu1 %343 }
  0x8d   : > { %v350_v15 = vsel %vm349_vm0, %v337_v10, %v344_v8 }
  0x90   : > { %v346_v11 = vpop.permute.xlu1 %345 }
  0x91   : > { %v351_v16 = vsel %vm349_vm0, %v338_v12, %v346_v11 }
  0x94   : > { %v370_v13 = vpop.permute.xlu0 %369 }
  0x95   : > { %v372_v17 = vmul.f32 %v370_v13, %v350_v15  ;;  %v373_v18 = vmul.f32 %v370_v13, %v351_v16 }
  0x98   : > { %v381_v19 = vpop.permute.xlu0 %380 }
  0x99   : > { %v383_v20 = vsel %vm363_vm5, %v381_v19, 0.0  ;;  %v384_v21 = vsel %vm364_vm6, %v381_v19, 0.0 }
  0x9a   : > { %v385_v22 = vadd.f32 %v383_v20, %v372_v17  ;;  %v386_v23 = vadd.f32 %v384_v21, %v373_v18 }
  0x9c   : > { %v387_v24 = vpack.c.bf16 %v385_v22, %v385_v22  ;;  %v388_v25 = vpack.c.bf16 %v386_v23, %v386_v23 }
  0x9e   : > { %v390_v26 = vrot.slane %v388_v25, 6  ;;  %v395_v27 = vrot.slane %v388_v25, 2  ;;  %v392_v28 = vrot.slane %v387_v24, 4 }
  0xa0   : > { %396 = vrot.lane.b32.xlu1 %v395_v27, %s757_s13  ;;  %393 = vrot.lane.b32.xlu0 %v392_v28, %s757_s13  ;;  %v401_v29 = vsel %vm398_vm8, %v387_v24, %v390_v26  ;;  %s758_s13 = smov [#allocation2]  }
  0xa1   : > { %s679_s14 = sshll.u32 %s758_s13, 4  ;;  %s680_s14 = int_to_ptr.vmem [resolvable:$false] %s679_s14 }
  0xa2   : > { %s681_s15 = scalar_lea.vmem %s680_s14, 128  ;;  %p682_p1 = scmp.lt.s32.totalorder %s876_s28, %s680_s14 }
  0xa3   : > { %p683_p2 = scmp.lt.s32.totalorder %s681_s15, %s675_s12 }
  0xa4   : > { %413 = vperm.xlu0 %674, %v410_v30  }
  0xa5   : > { %p684_p3 = por %p683_p2, %p682_p1 }
  0xa7   : > { %p685_p5 = pnand %p684_p3, %p678_p0 }
 0x112   : > { %v397_v31 = vpop.permute.xlu1 %396  ;;  %v394_v32 = vpop.permute.xlu0 %393 }
 0x113   : > { %v404_v33 = vsel %vm402_vm9, %v401_v29, %v394_v32 }
 0x114   : > { %v407_v34 = vsel %vm405_vm10, %v404_v33, %v397_v31 }
 0x115   : > { %609 = vmatpush3.bf16.msra.mxu0 %v407_v34 }
 0x118   : > { %611 = vmatmul.mubr.msk.bf16.vlgmr.msra.gmra.mxu0 %vm416_vm11, %v409_v35 }
 0x11f   : > { %v414_v36 = vpop.permute.xlu0 %413 }
 0x1d8   : > { %v454_v37 = vpop.f32.mrf.mxu0 }
 0x1d9   : > { %v455_v38 = vadd.f32 %v454_v37, %v414_v36 }
 0x1da   : > { %v612_v39 = vpop.f32.mrf.mxu0 }
 0x1db   : > { %461 = vst.msk [vmem:[%s312_s27] sm:$0xf] %vm460_vm12, %v455_v38 }
 0x1dc   : > { %v457_v40 = vpop.f32.mrf.mxu0 }
 0x1dd   : > { %688 = shalt.err (!%p685_p5)
}
 0x1de   : > { %s689_s16 = scalar_lea.hbm %s874_s11, 64  ;;  %s693_s19 = scalar_lea.hbm %s926_s6, 128 }
 0x1df   : > { %p690_p6 = scmp.ne.s32.totalorder %s874_s11, %s689_s16  ;;  %p694_p10 = scmp.lt.s32.totalorder %s874_s11, %s926_s6 }
 0x1e0   : > { %p695_p11 = scmp.lt.s32.totalorder %s693_s19, %s689_s16 }
 0x1e1   : > { %p691_p7 = pnand %p690_p6, %p834_p4 }
 0x1e2   : > { %p696_p12 = por %p695_p11, %p694_p10 }
 0x1e3   : > { %p692_p9 = pneg %p691_p7 }
 0x1e5   : > { %p697_p13 = pnand %p696_p12, %p692_p9 }
 0x1e7   : > { %700 = shalt.err (!%p697_p13)
}
 0x1e8   : > { %614 = dma.vmem_to_hbm [thread:$0]  (%p834_p4), %s876_s28, 64, %s874_s11, %s463_s24   ;;  %v613_v41 = vpop.f32.mrf.mxu0 }
 0x1e9 PF: > { %p620_p0 = scmp.ge.s32.totalorder %s751_s26, 2  ;;  %s489_s30 = sand.u32 1, %s731_s21  }
 0x1ea   : > { %s490_s8 = scalar_lea.sflag [#allocation3], %s489_s30 }
 0x1eb   : > { %p617_p1 = pnand %p620_p0, %p841_p8 }
 0x1ed   : > { %p618_p2 = pneg %p617_p1 }
 0x1ef   : > { %726 = dma.done.wait (%p618_p2), %s490_s8, 64  }
 0x1f0   : > { %728 = vsyncadd (%p618_p2), %s490_s8, 4294967232  ;;  %s19_s26 = sadd.s32 1, %s751_s26   ;;  %s929_s21 = smov %s735_s22 }
 0x1f1   : > { %p16_p3 = scmp.ge.s32.totalorder %s19_s26, 4   ;;  %s930_s22 = smov %s739_s23 }
 0x1f2   : > { %s931_s23 = smov %s847_s10  ;;  %s932_s24 = smov %s747_s25 }
 0x1f3   : > { %s933_s25 = smov %s935_s29  ;;  %18 = sbr.rel (!%p16_p3) target bundleno = 4 (0x4), region = 88 }
 0x1f8   :  { %495 = vsyncpa [#allocation3], 1 }
 0x1f9   :  { %497 = vsyncpa [#allocation3 + $0x1], 1 }

</bundles_post_ra>
